<compile_context>
chip_gen: v7x
topology: tpu7x:2x2x1
jax: 0.10.0
libtpu: 0.0.40
codegen_flags: <defaults>
</compile_context>

<pallas_src>
import jax
import jax.numpy as jnp
from jax.experimental import pallas as pl
from jax.experimental.pallas import tpu as pltpu


def _scaling_kernel(const_ref, x_ref, o_ref):
    # const_ref: VMEM [row_tile, 2]   (col 0 = shift, col 1 = 1/scale)
    # x_ref/o_ref: VMEM [row_tile, lane_tile]
    shift = const_ref[:, 0:1]       # [row_tile, 1] -> broadcast along lanes
    inv_scale = const_ref[:, 1:2]   # [row_tile, 1]
    o_ref[...] = (x_ref[...] - shift) * inv_scale


def _cdiv(a: int, b: int) -> int:
    return -(-a // b)


def _vmem_budget():
    """(block_budget_bytes, vmem_limit_bytes), chosen per TPU generation."""
    try:
        cap = int(pltpu.get_tpu_info().vmem_capacity_bytes)
    except Exception:
        cap = 64 * 1024 * 1024   # unknown chip: assume the small-VMEM case
    if cap <= 64 * 1024 * 1024:
        # v7x-class: 64 MiB physical VMEM.  2 bufs x (in + out) x 8 MiB = 32 MiB.
        return 8 * 1024 * 1024, 48 * 1024 * 1024
    # v5e/v6e-class: 128 MiB physical VMEM.  2 x 2 x 16 MiB = 64 MiB working set.
    return 16 * 1024 * 1024, 80 * 1024 * 1024


def _pick_tiles(R: int, L: int, itemsize: int, block_budget: int):
    """Row/lane block sizes: lane-dense, VMEM-budgeted, full-width when possible."""
    # Rows: keep all R = N*C rows in one block when the budget allows (for
    # LPIPS R = 3N is tiny).  A full-extent block dim is always layout-legal;
    # otherwise round down to the f32 sublane multiple of 8.
    max_rows = max(8, ((block_budget // (128 * itemsize)) // 8) * 8)
    row_tile = R if R <= max_rows else max_rows

    # Lanes: largest multiple of 128 that evenly divides the plane (so every
    # output tile takes the unmasked full-width store path), or the full plane.
    max_lane = max(128, block_budget // (row_tile * itemsize))
    cands = [d for d in range(128, L + 1, 128) if L % d == 0 and d <= max_lane]
    if L <= max_lane:
        cands.append(L)            # full-extent dim is always a legal block size
    if not cands:
        # No aligned divisor fits the budget: plain 128-multiple cap.  The
        # partial boundary tile relies on Pallas OOB-padding semantics (padded
        # writes discarded) — safe for a purely elementwise kernel.
        cands = [min((max_lane // 128) * 128, ((L + 127) // 128) * 128)]
    lane_tile = max(cands)

    # v7x has 2 TensorCores and "parallel" grid axes shard across them: keep
    # >= 2 (prefer 4) grid blocks when the tensor is large enough for the
    # split to matter; tiny inputs stay single-block (per-step overhead wins).
    total_bytes = R * L * itemsize
    if _cdiv(R, row_tile) * _cdiv(L, lane_tile) < 2 and total_bytes >= 2 * 1024 * 1024:
        want = 4 if total_bytes >= 8 * 1024 * 1024 else 2
        for w in (want, 2):
            split = [d for d in cands if _cdiv(L, d) >= w]
            if split:
                lane_tile = max(split)
                break

    return row_tile, lane_tile


def scaling_layer(x, shift, scale, *, min_pallas_bytes: int = 1 << 20):
    """x: f32[N, C, H, W]; shift/scale: f32[C].  Returns (x - shift) / scale."""
    N, C, H, W = x.shape
    assert shift.shape == (C,) and scale.shape == (C,)
    assert x.dtype == jnp.float32, "tiling assumes f32 (8-row sublane packing)"

    # Exact scalar reciprocals on the C values: the vector body becomes a pure
    # VPU subtract + multiply (within ~1-2 ulp of a true per-element divide).
    inv_scale = (1.0 / scale).astype(x.dtype)

    R = N * C                      # one row per (n, c) plane
    L = H * W                      # contiguous spatial plane along the lane axis
    itemsize = x.dtype.itemsize
    total_bytes = R * L * itemsize

    if total_bytes < min_pallas_bytes:
        # Degenerate sizes: pallas_call fixed overhead dominates -> plain XLA.
        return (x - shift[None, :, None, None]) * inv_scale[None, :, None, None]

    x2 = x.reshape(R, L)           # zero-copy view for contiguous NCHW

    # Per-row constants merged into one (R, 2) stream: col 0 = shift, col 1 = 1/scale.
    consts = jnp.stack(
        [jnp.tile(shift.astype(x.dtype), N), jnp.tile(inv_scale, N)], axis=-1)

    block_budget, vmem_limit = _vmem_budget()
    row_tile, lane_tile = _pick_tiles(R, L, itemsize, block_budget)
    grid = (_cdiv(R, row_tile), _cdiv(L, lane_tile))

    out2 = pl.pallas_call(
        _scaling_kernel,
        out_shape=jax.ShapeDtypeStruct((R, L), x.dtype),
        grid=grid,
        in_specs=[
            pl.BlockSpec((row_tile, 2), lambda i, j: (i, 0)),          # shift | 1/scale
            pl.BlockSpec((row_tile, lane_tile), lambda i, j: (i, j)),  # x tile
        ],
        out_specs=pl.BlockSpec((row_tile, lane_tile), lambda i, j: (i, j)),
        compiler_params=pltpu.CompilerParams(
            dimension_semantics=("parallel", "parallel"),
            vmem_limit_bytes=vmem_limit,
        ),
        cost_estimate=pl.CostEstimate(
            flops=2 * R * L,
            transcendentals=0,
            bytes_accessed=2 * total_bytes + int(consts.size) * itemsize,
        ),
    )(consts, x2)

    return out2.reshape(N, C, H, W)


if __name__ == "__main__":
    # The module's registered constants.
    shift = jnp.array([-0.030, -0.088, -0.188], dtype=jnp.float32)
    scale = jnp.array([0.458, 0.448, 0.450], dtype=jnp.float32)

    # Small NCHW RGB batch (the module fixes C == 3).
    key = jax.random.PRNGKey(0)
    x = jax.random.normal(key, (2, 3, 16, 16), dtype=jnp.float32)

    ref = (x - shift[None, :, None, None]) / scale[None, :, None, None]

    # Force the Pallas path even at this tiny test size (the wrapper would
    # otherwise take the plain-XLA fallback for < 1 MiB inputs).
    out = scaling_layer(x, shift, scale, min_pallas_bytes=0)
    jax.block_until_ready(out)
    assert out.shape == x.shape and out.dtype == x.dtype
    assert jnp.allclose(out, ref, atol=1e-6, rtol=1e-6)

    # Also exercise the tiny-input XLA fallback path once.
    out_fb = scaling_layer(x, shift, scale)
    jax.block_until_ready(out_fb)
    assert jnp.allclose(out_fb, ref, atol=1e-6, rtol=1e-6)

    print("KERNEL_OK")
</pallas_src>

<mosaic_0001>
module attributes {stable_mosaic.version = 11 : i64} {
  func.func @_scaling_kernel(%arg0: i32, %arg1: i32, %arg2: memref<6x2xf32, #tpu.memory_space<vmem>>, %arg3: memref<6x256xf32, #tpu.memory_space<vmem>>, %arg4: memref<6x256xf32, #tpu.memory_space<vmem>>) attributes {dimension_semantics = [#tpu.dimension_semantics<parallel>, #tpu.dimension_semantics<parallel>], iteration_bounds = array<i64: 1, 1>, scalar_prefetch = 0 : i64, scratch_operands = 0 : i64, tpu.core_type = #tpu.core_type<tc>, window_params = [{transform_indices = @transform_0, window_bounds = array<i64: 6, 2>}, {transform_indices = @transform_1, window_bounds = array<i64: 6, 256>}, {transform_indices = @transform_2, window_bounds = array<i64: 6, 256>}]} {
    %c0 = arith.constant 0 : index
    %c0_0 = arith.constant 0 : index
    %0 = vector.load %arg2[%c0, %c0_0] : memref<6x2xf32, #tpu.memory_space<vmem>>, vector<6x1xf32>
    %c0_1 = arith.constant 0 : index
    %c1 = arith.constant 1 : index
    %1 = vector.load %arg2[%c0_1, %c1] : memref<6x2xf32, #tpu.memory_space<vmem>>, vector<6x1xf32>
    %c0_2 = arith.constant 0 : index
    %c0_3 = arith.constant 0 : index
    %2 = vector.load %arg3[%c0_2, %c0_3] : memref<6x256xf32, #tpu.memory_space<vmem>>, vector<6x256xf32>
    %3 = vector.broadcast %0 : vector<6x1xf32> to vector<6x256xf32>
    %4 = arith.subf %2, %3 : vector<6x256xf32>
    %5 = vector.broadcast %1 : vector<6x1xf32> to vector<6x256xf32>
    %6 = arith.mulf %4, %5 : vector<6x256xf32>
    %c0_4 = arith.constant 0 : index
    %c0_5 = arith.constant 0 : index
    %7 = vector.load %arg4[%c0_4, %c0_5] : memref<6x256xf32, #tpu.memory_space<vmem>>, vector<6x256xf32>
    tpu.vector_store %arg4[%c0_4, %c0_5], %6 {strides = array<i32>} : memref<6x256xf32, #tpu.memory_space<vmem>>, vector<6x256xf32>,
    return
  }
  func.func @transform_0(%arg0: i32, %arg1: i32) -> (i32, i32) {
    %c0_i32 = arith.constant 0 : i32
    %c0_i32_0 = arith.constant 0 : i32
    return %arg0, %c0_i32 : i32, i32
  }
  func.func @transform_1(%arg0: i32, %arg1: i32) -> (i32, i32) {
    %c0_i32 = arith.constant 0 : i32
    return %arg0, %arg1 : i32, i32
  }
  func.func @transform_2(%arg0: i32, %arg1: i32) -> (i32, i32) {
    %c0_i32 = arith.constant 0 : i32
    return %arg0, %arg1 : i32, i32
  }
}

</mosaic_0001>

<bundles_post_ra>
// kernel: tpu_custom_call.1
= control target key start
LH: loop header
LB: loop body
LE: loop exit
PB: predicated region body
PF: predicated region fallthrough
CT: control target
= control target key end

     0   :  { %7 = vsyncpa [#allocation3], 0  ;;  %s157_s0 = inlined_call_operand.vmem [shape: f32[6,2], index: 0, kind: input, shape index: {}]   ;;  %s158_s1 = inlined_call_operand.hbm [shape: f32[6,256], index: 1, kind: input, shape index: {}]   ;;  %s159_s2 = inlined_call_operand.hbm [shape: f32[6,256], index: 2, kind: output, shape index: {}]  }
   0x1   :  { %8 = vsyncpa [#allocation4], 0  ;;  %s111_s9 = smov [#allocation2]   ;;  %s63_s13 = scalar_lea.hbm %s158_s1, 256 }
   0x2   :  { %s17_s10 = sshll.u32 %s111_s9, 4  ;;  %p64_p0 = scmp.ne.s32.totalorder %s158_s1, %s63_s13  ;;  %s18_s10 = int_to_ptr.vmem [resolvable:$true] %s17_s10 }
   0x3   :  { %p67_p1 = scmp.lt.u32.totalorder %s63_s13, %s158_s1 }
   0x5   :  { %p69_p2 = pnand %p67_p1, %p64_p0 }
   0x7   :  { %72 = shalt.err (!%p69_p2)
}
   0x8   :  { %s73_s18 = scalar_lea.vmem %s18_s10, 256  ;;  %p78_p4 = scmp.lt.s32.totalorder %s18_s10, %s18_s10 }
   0x9   :  { %p74_p3 = scmp.ne.s32.totalorder %s18_s10, %s73_s18  ;;  %p79_p5 = scmp.lt.s32.totalorder %s73_s18, %s73_s18 }
   0xb   :  { %p80_p6 = por %p79_p5, %p78_p4 }
   0xd   :  { %p81_p7 = pnand %p80_p6, %p74_p3 }
   0xf   :  { %84 = shalt.err (!%p81_p7)
}
  0x10   :  { %20 = dma.hbm_to_vmem [thread:$0]  %s158_s1, 256, %s18_s10, [#allocation3]  }
  0x11   :  { %107 = dma.done.wait [#allocation3], 256  }
  0x12   :  { %108 = vsyncadd [#allocation3], 4294967040  ;;  %v112_v0 = vmov 0   ;;  %v24_v1 = vld [vmem:[%s157_s0] sm:$0x3f]  ;;  %v113_v2 = vmov 1  }
  0x13   :  { %61 = vset.pattern.permute.xlu0 %v112_v0  ;;  %v25_v4 = vld [vmem:[#allocation2] sm:$0x3f]  ;;  %v26_v5 = vld [vmem:[#allocation2 + $0x8] sm:$0x3f]  ;;  %s114_s23 = smov [#allocation5]  }
  0x14   :  { %29 = vperm.xlu0 %61, %v24_v1   ;;  %s48_s24 = sshll.u32 %s114_s23, 4  ;;  %s49_s24 = int_to_ptr.vmem [resolvable:$true] %s48_s24 }
  0x15   :  { %s85_s1 = scalar_lea.vmem %s49_s24, 256  ;;  %p90_p9 = scmp.lt.s32.totalorder %s49_s24, %s49_s24 }
  0x16   :  { %p86_p8 = scmp.ne.s32.totalorder %s49_s24, %s85_s1  ;;  %p91_p10 = scmp.lt.s32.totalorder %s85_s1, %s85_s1 }
  0x18   :  { %62 = vset.pattern.permute.xlu0 %v113_v2  ;;  %p92_p11 = por %p91_p10, %p90_p9 }
  0x19   :  { %35 = vperm.xlu0 %62, %v24_v1  }
  0x1a   :  { %p93_p12 = pnand %p92_p11, %p86_p8 }
  0x93   :  { %v30_v3 = vpop.permute.xlu0 %29 }
  0x94   :  { %v32_v6 = vsub.f32 %v25_v4, %v30_v3  ;;  %v33_v7 = vsub.f32 %v26_v5, %v30_v3 }
  0x98   :  { %v36_v8 = vpop.permute.xlu0 %35 }
  0x99   :  { %v38_v9 = vmul.f32 %v36_v8, %v32_v6  ;;  %v39_v10 = vmul.f32 %v36_v8, %v33_v7 }
  0x9b   :  { %40 = vst [vmem:[#allocation5] sm:$0x3f] %v38_v9  ;;  %41 = vst [vmem:[#allocation5 + $0x8] sm:$0x3f] %v39_v10 }
  0x9c   :  { %96 = shalt.err (!%p93_p12)
}
  0x9d   :  { %s97_s26 = scalar_lea.hbm %s159_s2, 256 }
  0x9e   :  { %p98_p13 = scmp.ne.s32.totalorder %s159_s2, %s97_s26  ;;  %p101_p0 = scmp.lt.u32.totalorder %s97_s26, %s159_s2 }
  0xa0   :  { %p103_p1 = pnand %p101_p0, %p98_p13 }
  0xa2   :  { %106 = shalt.err (!%p103_p1)
}
  0xa3   :  { %51 = dma.vmem_to_hbm [thread:$0]  %s49_s24, 256, %s159_s2, [#allocation4]  }
  0xa4   :  { %109 = dma.done.wait [#allocation4], 256  }
  0xa5   :  { %110 = vsyncadd [#allocation4], 4294967040 }
  0xa6   :  { %55 = vsyncpa [#allocation3], 1 }
  0xa7   :  { %56 = vsyncpa [#allocation4], 1 }

</bundles_post_ra>
